<compile_context>
chip_gen: v7x
topology: tpu7x:2x2x1
jax: 0.10.0
libtpu: 0.0.40
codegen_flags: <defaults>
</compile_context>

<pallas_src>
import math

import jax
import jax.numpy as jnp
from jax.experimental import pallas as pl
from jax.experimental.pallas import tpu as pltpu


# ----------------------------------------------------------------------------
# Parameter setup (matches the PyTorch __init__ exactly).
# ----------------------------------------------------------------------------
def build_positional_encoding(d_model: int, max_seq_length: int = 100) -> jnp.ndarray:
    position = jnp.arange(0, max_seq_length, dtype=jnp.float32)[:, None]          # (L, 1)
    div_term = jnp.exp(
        jnp.arange(0, d_model, 2, dtype=jnp.float32) * (-math.log(10000.0) / d_model)
    )                                                                              # (D/2,)
    angles = position * div_term                                                   # (L, D/2)
    pe = jnp.zeros((max_seq_length, d_model), dtype=jnp.float32)
    pe = pe.at[:, 0::2].set(jnp.sin(angles))
    pe = pe.at[:, 1::2].set(jnp.cos(angles))
    return pe                                                                      # (L, D)


# ----------------------------------------------------------------------------
# Kernel body: one broadcast vadd per (row_tile, lane_tile) block.
# ----------------------------------------------------------------------------
def _pe_add_kernel(x_ref, pe_ref, o_ref):
    # x_ref / o_ref: (tb, tl) in x.dtype; pe_ref: (1, tl) in f32.
    # Add in f32 (PE table is never pre-rounded to bf16), cast on the store.
    o_ref[...] = (x_ref[...].astype(jnp.float32) + pe_ref[...]).astype(o_ref.dtype)


# ----------------------------------------------------------------------------
# Tiling / VMEM accounting helpers.
# ----------------------------------------------------------------------------
_LANE = 128
_SLACK_BYTES = 4 * 1024 * 1024          # headroom for internal scratch/semaphores
_MIB = 1024 * 1024


def _round_up(x: int, m: int) -> int:
    return ((x + m - 1) // m) * m


def _round_down(x: int, m: int) -> int:
    return (x // m) * m


def _cdiv(a: int, b: int) -> int:
    return -(-a // b)


def _tpu_vmem_bytes() -> int:
    """Physical VMEM per core; assume the smaller 64 MiB (v7x) if unknown."""
    try:
        return int(pltpu.get_tpu_info().vmem_capacity_bytes)
    except Exception:
        return 64 * _MIB


def _sublane_pack(itemsize: int) -> int:
    # 8 rows/vreg for 4-byte, 16 for 2-byte, 32 for 1-byte dtypes.
    return max(8, 32 // max(1, itemsize))


def _choose_tiles(B: int, L: int, itemsize: int):
    vmem_cap = _tpu_vmem_bytes()
    # Per-block byte target (padded size): smaller on v7x (64 MiB VMEM),
    # larger on v5e/v6e (128 MiB) to amortize per-grid-step overhead.
    target = 3 * _MIB if vmem_cap <= 64 * _MIB else 6 * _MIB
    sub = _sublane_pack(itemsize)

    # Lane tile: as wide as possible assuming the *minimum padded* row count.
    tl_cap = max(_LANE, _round_down(target // (sub * itemsize), _LANE))
    tl = L if L <= tl_cap else tl_cap
    tl_pad = _round_up(tl, _LANE)

    # Row tile: whatever padded row count still fits the target at this tl.
    rows_cap = max(sub, _round_down(target // (tl_pad * itemsize), sub))
    tb = B if B <= rows_cap else rows_cap
    return tb, tl, vmem_cap


def _maybe_split_for_two_cores(B: int, L: int, tb: int, tl: int, itemsize: int):
    """v7x has 2 TCs: make sure a big single-block problem gets >= 2 grid steps."""
    sub = _sublane_pack(itemsize)
    steps = _cdiv(B, tb) * _cdiv(L, tl)
    block_bytes = _round_up(tb, sub) * _round_up(tl, _LANE) * itemsize
    if steps >= 2 or block_bytes < 2 * _MIB:      # already split, or too small to matter
        return tb, tl
    if L >= 2 * _LANE:
        return tb, max(_LANE, _round_down(_cdiv(L, 2), _LANE))
    if B >= 2 * sub:
        return max(sub, _round_up(_cdiv(B, 2), sub)), tl
    return tb, tl


def _vmem_limit_bytes(tb: int, tl: int, itemsize: int, vmem_cap: int) -> int:
    """Actual padded, double-buffered footprint + slack, capped below physical VMEM."""
    sub = _sublane_pack(itemsize)
    tl_pad = _round_up(tl, _LANE)
    xo_blk = _round_up(tb, sub) * tl_pad * itemsize      # one x block == one out block
    pe_blk = 8 * tl_pad * 4                              # f32 PE row, sublane-padded to 8
    need = 2 * (2 * xo_blk + pe_blk) + _SLACK_BYTES      # 2-deep pipelining
    return min(max(need, 16 * _MIB), vmem_cap - 8 * _MIB)


# ----------------------------------------------------------------------------
# Forward wrapper.
# ----------------------------------------------------------------------------
def positional_encoding_forward(
    x: jnp.ndarray,
    pe_full: jnp.ndarray,
    *,
    force_pallas: bool = True,
    donate_x: bool = False,
) -> jnp.ndarray:
    """x: (B, S, D); pe_full: (max_seq_length, D). Returns x + pe[:S] (broadcast over B)."""
    B, S, D = x.shape
    L = S * D
    itemsize = x.dtype.itemsize

    pe2d = pe_full[:S, :].reshape(1, L).astype(jnp.float32)   # keep f32 for the add

    # Tiny inputs: fixed kernel/grid overhead dominates a single streaming add;
    # optionally let XLA fuse the plain add instead of launching the kernel.
    if not force_pallas and B * L * itemsize < (1 << 20):
        return (x.astype(jnp.float32) + pe2d.reshape(1, S, D)).astype(x.dtype)

    x2d = x.reshape(B, L)                                      # lane-dense 2-D view

    tb, tl, vmem_cap = _choose_tiles(B, L, itemsize)
    tb, tl = _maybe_split_for_two_cores(B, L, tb, tl, itemsize)
    grid = (_cdiv(B, tb), _cdiv(L, tl))

    out2d = pl.pallas_call(
        _pe_add_kernel,
        out_shape=jax.ShapeDtypeStruct((B, L), x.dtype),
        grid_spec=pltpu.PrefetchScalarGridSpec(
            num_scalar_prefetch=0,
            grid=grid,
            in_specs=[
                pl.BlockSpec((tb, tl), lambda i, j: (i, j)),   # x tile
                pl.BlockSpec((1, tl), lambda i, j: (0, j)),    # PE slice (batch ignored)
            ],
            out_specs=pl.BlockSpec((tb, tl), lambda i, j: (i, j)),
        ),
        compiler_params=pltpu.CompilerParams(
            dimension_semantics=("parallel", "parallel"),
            vmem_limit_bytes=_vmem_limit_bytes(tb, tl, itemsize, vmem_cap),
        ),
        cost_estimate=pl.CostEstimate(
            flops=B * L,
            transcendentals=0,
            bytes_accessed=2 * B * L * itemsize + L * 4,
        ),
        input_output_aliases=({0: 0} if donate_x else {}),
    )(x2d, pe2d)

    return out2d.reshape(B, S, D)


if __name__ == "__main__":
    B, S, D = 2, 8, 32
    max_seq_length = 100

    key = jax.random.PRNGKey(0)
    x = jax.random.normal(key, (B, S, D), dtype=jnp.float32)

    pe_full = build_positional_encoding(D, max_seq_length)

    out = jax.block_until_ready(positional_encoding_forward(x, pe_full, force_pallas=True))

    # Reference check in plain JAX (same semantics as the PyTorch forward).
    ref = x + pe_full[None, :S, :]
    assert out.shape == (B, S, D)
    assert jnp.allclose(out, ref, atol=1e-6), "mismatch vs reference"

    print("KERNEL_OK")
</pallas_src>

<mosaic_0001>
module attributes {stable_mosaic.version = 11 : i64} {
  func.func @_pe_add_kernel(%arg0: i32, %arg1: i32, %arg2: memref<2x256xf32, #tpu.memory_space<vmem>>, %arg3: memref<1x256xf32, #tpu.memory_space<vmem>>, %arg4: memref<2x256xf32, #tpu.memory_space<vmem>>) attributes {dimension_semantics = [#tpu.dimension_semantics<parallel>, #tpu.dimension_semantics<parallel>], iteration_bounds = array<i64: 1, 1>, scalar_prefetch = 0 : i64, scratch_operands = 0 : i64, tpu.core_type = #tpu.core_type<tc>, window_params = [{transform_indices = @transform_0, window_bounds = array<i64: 2, 256>}, {transform_indices = @transform_1, window_bounds = array<i64: 1, 256>}, {transform_indices = @transform_2, window_bounds = array<i64: 2, 256>}]} {
    %c0 = arith.constant 0 : index
    %c0_0 = arith.constant 0 : index
    %0 = vector.load %arg2[%c0, %c0_0] : memref<2x256xf32, #tpu.memory_space<vmem>>, vector<2x256xf32>
    %c0_1 = arith.constant 0 : index
    %c0_2 = arith.constant 0 : index
    %1 = vector.load %arg3[%c0_1, %c0_2] : memref<1x256xf32, #tpu.memory_space<vmem>>, vector<1x256xf32>
    %2 = vector.broadcast %1 : vector<1x256xf32> to vector<2x256xf32>
    %3 = arith.addf %0, %2 : vector<2x256xf32>
    %c0_3 = arith.constant 0 : index
    %c0_4 = arith.constant 0 : index
    %4 = vector.load %arg4[%c0_3, %c0_4] : memref<2x256xf32, #tpu.memory_space<vmem>>, vector<2x256xf32>
    tpu.vector_store %arg4[%c0_3, %c0_4], %3 {strides = array<i32>} : memref<2x256xf32, #tpu.memory_space<vmem>>, vector<2x256xf32>,
    return
  }
  func.func @transform_0(%arg0: i32, %arg1: i32) -> (i32, i32) {
    %c0_i32 = arith.constant 0 : i32
    return %arg0, %arg1 : i32, i32
  }
  func.func @transform_1(%arg0: i32, %arg1: i32) -> (i32, i32) {
    %c0_i32 = arith.constant 0 : i32
    %c0_i32_0 = arith.constant 0 : i32
    return %c0_i32, %arg1 : i32, i32
  }
  func.func @transform_2(%arg0: i32, %arg1: i32) -> (i32, i32) {
    %c0_i32 = arith.constant 0 : i32
    return %arg0, %arg1 : i32, i32
  }
}

</mosaic_0001>

<bundles_post_ra>
// kernel: tpu_custom_call.1
= control target key start
LH: loop header
LB: loop body
LE: loop exit
PB: predicated region body
PF: predicated region fallthrough
CT: control target
= control target key end

     0   :  { %7 = vsyncpa [#allocation3], 0  ;;  %s157_s0 = inlined_call_operand.hbm [shape: f32[2,256], index: 0, kind: input, shape index: {}]   ;;  %s158_s1 = inlined_call_operand.vmem [shape: f32[1,256], index: 1, kind: input, shape index: {}]   ;;  %s159_s2 = inlined_call_operand.hbm [shape: f32[2,256], index: 2, kind: output, shape index: {}]  }
   0x1   :  { %8 = vsyncpa [#allocation4], 0  ;;  %s112_s9 = smov [#allocation2]   ;;  %s64_s13 = scalar_lea.hbm %s157_s0, 64 }
   0x2   :  { %s15_s10 = sshll.u32 %s112_s9, 4  ;;  %p65_p0 = scmp.ne.s32.totalorder %s157_s0, %s64_s13  ;;  %s16_s10 = int_to_ptr.vmem [resolvable:$true] %s15_s10 }
   0x3   :  { %p68_p1 = scmp.lt.u32.totalorder %s64_s13, %s157_s0 }
   0x5   :  { %p70_p2 = pnand %p68_p1, %p65_p0 }
   0x7   :  { %73 = shalt.err (!%p70_p2)
}
   0x8   :  { %s74_s18 = scalar_lea.vmem %s16_s10, 64  ;;  %p79_p4 = scmp.lt.s32.totalorder %s16_s10, %s16_s10 }
   0x9   :  { %p75_p3 = scmp.ne.s32.totalorder %s16_s10, %s74_s18  ;;  %p80_p5 = scmp.lt.s32.totalorder %s74_s18, %s74_s18 }
   0xb   :  { %p81_p6 = por %p80_p5, %p79_p4 }
   0xd   :  { %p82_p7 = pnand %p81_p6, %p75_p3 }
   0xf   :  { %85 = shalt.err (!%p82_p7)
}
  0x10   :  { %18 = dma.hbm_to_vmem [thread:$0]  %s157_s0, 64, %s16_s10, [#allocation3]  }
  0x11   :  { %108 = dma.done.wait [#allocation3], 64  }
  0x12   :  { %109 = vsyncadd [#allocation3], 4294967232  ;;  %v27_v0 = vlaneseq  ;;  %v113_v1 = vmov 1983009808   ;;  %v25_v7 = vld [vmem:[%s158_s1] sm:$0x3] }
  0x13   :  { %v37_v2 = vunpack.c.l.s4 %v113_v1  ;;  %v24_v12 = vld [vmem:[#allocation2] sm:$0xf]  ;;  %s114_s23 = smov [#allocation5]  }
  0x14   :  { %v28_v3 = vshrl.u32 %v27_v0, 7  ;;  %s52_s0 = sshll.u32 %s114_s23, 4  ;;  %s53_s0 = int_to_ptr.vmem [resolvable:$true] %s52_s0 }
  0x15   :  { %v38_v6 = vunpack.c.0.s8 %v37_v2  ;;  %s86_s24 = scalar_lea.vmem %s53_s0, 64  ;;  %p91_p9 = scmp.lt.s32.totalorder %s53_s0, %s53_s0 }
  0x16   :  { %v29_v4 = vsub.s32 0, %v28_v3  ;;  %v33_v5 = vsub.s32 1, %v28_v3  ;;  %p87_p8 = scmp.ne.s32.totalorder %s53_s0, %s86_s24  ;;  %p92_p10 = scmp.lt.s32.totalorder %s86_s24, %s86_s24 }
  0x17   :  { %v41_v10 = vsub.s32 %v38_v6, %v28_v3 }
  0x18   :  { %v30_v8 = vrot.slane %v25_v7, %v29_v4  ;;  %v34_v9 = vrot.slane %v25_v7, %v33_v5  ;;  %p93_p11 = por %p92_p10, %p91_p9 }
  0x1a   :  { %v35_v11 = vcombine.low %v30_v8, %v34_v9  ;;  %p94_p12 = pnand %p93_p11, %p87_p8 }
  0x1c   :  { %v42_v13 = vrot.slane %v35_v11, %v41_v10 }
  0x1e   :  { %v44_v14 = vadd.f32 %v42_v13, %v24_v12 }
  0x20   :  { %45 = vst [vmem:[#allocation5] sm:$0xf] %v44_v14 }
  0x21   :  { %97 = shalt.err (!%p94_p12)
}
  0x22   :  { %s98_s26 = scalar_lea.hbm %s159_s2, 64 }
  0x23   :  { %p99_p13 = scmp.ne.s32.totalorder %s159_s2, %s98_s26  ;;  %p102_p0 = scmp.lt.u32.totalorder %s98_s26, %s159_s2 }
  0x25   :  { %p104_p1 = pnand %p102_p0, %p99_p13 }
  0x27   :  { %107 = shalt.err (!%p104_p1)
}
  0x28   :  { %55 = dma.vmem_to_hbm [thread:$0]  %s53_s0, 64, %s159_s2, [#allocation4]  }
  0x29   :  { %110 = dma.done.wait [#allocation4], 64  }
  0x2a   :  { %111 = vsyncadd [#allocation4], 4294967232 }
  0x2b   :  { %59 = vsyncpa [#allocation3], 1 }
  0x2c   :  { %60 = vsyncpa [#allocation4], 1 }

</bundles_post_ra>
